<compile_context>
chip_gen: v7x
topology: tpu7x:2x2x1
jax: 0.10.0
libtpu: 0.0.40
codegen_flags: <defaults>
</compile_context>

<pallas_src>
import jax
import jax.numpy as jnp
from jax.experimental import pallas as pl
from jax.experimental.pallas import tpu as pltpu


def se_kernel(x_ref, w1t_ref, w2t_ref, o_ref):
    # x_ref / o_ref: (B_BLK, C, HW)
    # w1t_ref:       (C, Ch)   (first Linear weight, pre-transposed)
    # w2t_ref:       (Ch, C)   (second Linear weight, pre-transposed)
    x = x_ref[...]                                            # native dtype

    # Squeeze: global average pool over spatial positions (accumulate in f32).
    pooled = jnp.mean(x.astype(jnp.float32), axis=2)          # (B_BLK, C)

    # Excitation: Linear -> ReLU -> Linear -> Sigmoid (bias-free), batched
    # over the whole block so the MXU sees a real (B_BLK, C) @ (C, Ch) matmul.
    h = jnp.dot(pooled, w1t_ref[...].astype(jnp.float32),
                preferred_element_type=jnp.float32)           # (B_BLK, Ch)
    h = jnp.maximum(h, 0.0)
    s = jnp.dot(h, w2t_ref[...].astype(jnp.float32),
                preferred_element_type=jnp.float32)           # (B_BLK, C)
    gate = jax.nn.sigmoid(s).astype(x.dtype)                  # (B_BLK, C)

    # Scale: broadcast the per-channel gate over the lane (HW) axis, keeping
    # the big tile in its native dtype (no full-tile f32 round trip).
    o_ref[...] = x * gate[:, :, None]


def _choose_b_blk(B, C, HW, itemsize, vmem_budget_bytes=20 * 1024 * 1024):
    """Pick how many batch elements each grid step processes."""
    # The (C, HW) tile appears twice (input + output), each double-buffered.
    per_b = max(1, C * HW * itemsize * 2 * 2)
    b_blk = max(1, vmem_budget_bytes // per_b)
    if B >= 2:
        # Keep at least 2 grid steps so v7x's two TensorCores both get work.
        b_blk = min(b_blk, B // 2)
    b_blk = max(1, min(b_blk, B))
    while B % b_blk != 0:          # evenly divide B -> no partial blocks
        b_blk -= 1
    return b_blk


@jax.jit
def se_forward(x, w1, w2):
    """x: (B, C, H, W). w1: (C//r, C), w2: (C, C//r). Returns (B, C, H, W)."""
    B, C, H, W = x.shape
    Ch = w1.shape[0]
    HW = H * W
    x2 = x.reshape(B, C, HW)
    # Pre-transpose the tiny weights once in the wrapper (layout glue).
    w1t = w1.T        # (C, Ch)
    w2t = w2.T        # (Ch, C)

    b_blk = _choose_b_blk(B, C, HW, x.dtype.itemsize)
    grid = (B // b_blk,)

    out = pl.pallas_call(
        se_kernel,
        out_shape=jax.ShapeDtypeStruct((B, C, HW), x.dtype),
        grid_spec=pltpu.PrefetchScalarGridSpec(
            num_scalar_prefetch=0,
            grid=grid,
            in_specs=[
                pl.BlockSpec((b_blk, C, HW), lambda i: (i, 0, 0)),
                pl.BlockSpec((C, Ch), lambda i: (0, 0)),
                pl.BlockSpec((Ch, C), lambda i: (0, 0)),
            ],
            out_specs=pl.BlockSpec((b_blk, C, HW), lambda i: (i, 0, 0)),
        ),
        input_output_aliases={0: 0},
        compiler_params=pltpu.CompilerParams(
            dimension_semantics=("parallel",),
            vmem_limit_bytes=32 * 1024 * 1024,
        ),
    )(x2, w1t, w2t)

    return out.reshape(B, C, H, W)


def se_reference(x, w1, w2):
    """Plain-JAX reference mirroring the PyTorch forward."""
    y = jnp.mean(x, axis=(2, 3))                              # (B, C)
    y = jnp.maximum(y @ w1.T, 0.0)                            # (B, C//r)
    y = jax.nn.sigmoid(y @ w2.T)                              # (B, C)
    return x * y[:, :, None, None]


if __name__ == "__main__":
    def run_case(key, B, C, H, W, reduction):
        Ch = max(1, C // reduction)
        kx, k1, k2 = jax.random.split(key, 3)
        x = jax.random.normal(kx, (B, C, H, W), dtype=jnp.float32)
        # PyTorch Linear weight shape convention: (out_features, in_features).
        w1 = jax.random.normal(k1, (Ch, C), dtype=jnp.float32) * (1.0 / C) ** 0.5
        w2 = jax.random.normal(k2, (C, Ch), dtype=jnp.float32) * (1.0 / Ch) ** 0.5

        out = jax.block_until_ready(se_forward(x, w1, w2))
        ref = jax.block_until_ready(se_reference(x, w1, w2))
        assert out.shape == x.shape and out.dtype == x.dtype
        assert jnp.allclose(out, ref, atol=1e-5, rtol=1e-5), \
            f"mismatch vs reference for shape {(B, C, H, W)}"

    key = jax.random.PRNGKey(0)
    ka, kb = jax.random.split(key)
    # B_BLK = 2, grid = (2,): exercises the batched (multi-element) block path.
    run_case(ka, 4, 64, 16, 16, 16)
    # B_BLK = 1, grid = (2,): small-batch fallback path.
    run_case(kb, 2, 32, 8, 8, 8)
    print("KERNEL_OK")
</pallas_src>

<mosaic_0001>
module attributes {stable_mosaic.version = 11 : i64} {
  func.func @se_kernel(%arg0: i32, %arg1: memref<2x64x256xf32, #tpu.memory_space<vmem>>, %arg2: memref<64x4xf32, #tpu.memory_space<vmem>>, %arg3: memref<4x64xf32, #tpu.memory_space<vmem>>, %arg4: memref<2x64x256xf32, #tpu.memory_space<vmem>>) attributes {dimension_semantics = [#tpu.dimension_semantics<parallel>], iteration_bounds = array<i64: 2>, scalar_prefetch = 0 : i64, scratch_operands = 0 : i64, tpu.core_type = #tpu.core_type<tc>, window_params = [{transform_indices = @transform_0, window_bounds = array<i64: 2, 64, 256>}, {pipeline_mode = #tpu.pipeline_mode<synchronous>, transform_indices = @transform_1, window_bounds = array<i64: 64, 4>}, {pipeline_mode = #tpu.pipeline_mode<synchronous>, transform_indices = @transform_2, window_bounds = array<i64: 4, 64>}, {transform_indices = @transform_3, window_bounds = array<i64: 2, 64, 256>}]} {
    %c0 = arith.constant 0 : index
    %c0_0 = arith.constant 0 : index
    %c0_1 = arith.constant 0 : index
    %0 = vector.load %arg1[%c0, %c0_0, %c0_1] : memref<2x64x256xf32, #tpu.memory_space<vmem>>, vector<2x64x256xf32>
    %cst = arith.constant dense<0.000000e+00> : vector<2x64xf32>
    %1 = vector.multi_reduction <add>, %0, %cst [2] : vector<2x64x256xf32> to vector<2x64xf32>
    %cst_2 = arith.constant 2.560000e+02 : f32
    %2 = vector.broadcast %cst_2 : f32 to vector<2x64xf32>
    %3 = arith.divf %1, %2 : vector<2x64xf32>
    %c0_3 = arith.constant 0 : index
    %c0_4 = arith.constant 0 : index
    %4 = vector.load %arg2[%c0_3, %c0_4] : memref<64x4xf32, #tpu.memory_space<vmem>>, vector<64x4xf32>
    %cst_5 = arith.constant dense<0.000000e+00> : vector<2x4xf32>
    %5 = tpu.matmul %3, %4, %cst_5 {dimension_numbers = #tpu.dot_dimension_numbers<[1], [0], [0], [1], [0, 0, 1, 1], [], []>} : vector<2x64xf32>, vector<64x4xf32>, vector<2x4xf32> -> vector<2x4xf32>
    %cst_6 = arith.constant 0.000000e+00 : f32
    %6 = vector.broadcast %cst_6 : f32 to vector<2x4xf32>
    %7 = arith.maximumf %5, %6 : vector<2x4xf32>
    %c0_7 = arith.constant 0 : index
    %c0_8 = arith.constant 0 : index
    %8 = vector.load %arg3[%c0_7, %c0_8] : memref<4x64xf32, #tpu.memory_space<vmem>>, vector<4x64xf32>
    %cst_9 = arith.constant dense<0.000000e+00> : vector<2x64xf32>
    %9 = tpu.matmul %7, %8, %cst_9 {dimension_numbers = #tpu.dot_dimension_numbers<[1], [0], [0], [1], [0, 0, 1, 1], [], []>} : vector<2x4xf32>, vector<4x64xf32>, vector<2x64xf32> -> vector<2x64xf32>
    %10 = arith.negf %9 : vector<2x64xf32>
    %11 = math.exp %10 : vector<2x64xf32>
    %cst_10 = arith.constant 1.000000e+00 : f32
    %12 = vector.broadcast %cst_10 : f32 to vector<2x64xf32>
    %13 = arith.addf %12, %11 : vector<2x64xf32>
    %14 = arith.divf %12, %13 : vector<2x64xf32>
    %15 = vector.shape_cast %14 : vector<2x64xf32> to vector<2x64x1xf32>
    %16 = vector.broadcast %15 : vector<2x64x1xf32> to vector<2x64x256xf32>
    %17 = arith.mulf %0, %16 : vector<2x64x256xf32>
    %c0_11 = arith.constant 0 : index
    %c0_12 = arith.constant 0 : index
    %c0_13 = arith.constant 0 : index
    %18 = vector.load %arg4[%c0_11, %c0_12, %c0_13] : memref<2x64x256xf32, #tpu.memory_space<vmem>>, vector<2x64x256xf32>
    tpu.vector_store %arg4[%c0_11, %c0_12, %c0_13], %17 {strides = array<i32>} : memref<2x64x256xf32, #tpu.memory_space<vmem>>, vector<2x64x256xf32>,
    return
  }
  func.func @transform_0(%arg0: i32) -> (i32, i32, i32) {
    %c0_i32 = arith.constant 0 : i32
    %c0_i32_0 = arith.constant 0 : i32
    %c0_i32_1 = arith.constant 0 : i32
    return %arg0, %c0_i32, %c0_i32_0 : i32, i32, i32
  }
  func.func @transform_1(%arg0: i32) -> (i32, i32) {
    %c0_i32 = arith.constant 0 : i32
    %c0_i32_0 = arith.constant 0 : i32
    %c0_i32_1 = arith.constant 0 : i32
    return %c0_i32, %c0_i32_0 : i32, i32
  }
  func.func @transform_2(%arg0: i32) -> (i32, i32) {
    %c0_i32 = arith.constant 0 : i32
    %c0_i32_0 = arith.constant 0 : i32
    %c0_i32_1 = arith.constant 0 : i32
    return %c0_i32, %c0_i32_0 : i32, i32
  }
  func.func @transform_3(%arg0: i32) -> (i32, i32, i32) {
    %c0_i32 = arith.constant 0 : i32
    %c0_i32_0 = arith.constant 0 : i32
    %c0_i32_1 = arith.constant 0 : i32
    return %arg0, %c0_i32, %c0_i32_0 : i32, i32, i32
  }
}

</mosaic_0001>

<bundles_post_ra>
// kernel: se_forward.1
= control target key start
LH: loop header
LB: loop body
LE: loop exit
PB: predicated region body
PF: predicated region fallthrough
CT: control target
= control target key end

     0   :  { %s859_s12 = smov 0   ;;  %s1130_s0 = inlined_call_operand.vmem [shape: f32[4,64,256], index: 0, kind: input, shape index: {}, may-alias: {0,3}]   ;;  %s1131_s1 = inlined_call_operand.vmem [shape: f32[64,4], index: 1, kind: input, shape index: {}]   ;;  %s1132_s2 = inlined_call_operand.vmem [shape: f32[4,64], index: 2, kind: input, shape index: {}]   ;;  %s1133_s3 = inlined_call_operand.vmem [shape: f32[4,64,256], index: 3, kind: output, shape index: {}, may-alias: {0,3}]  }
   0x1 LB: > { %s747_s13 = sadd.s32 4294967295, %s834_s12   ;;  %p751_p0 = scmp.ge.s32.totalorder %s834_s12, 1  ;;  %s834_s12 = sphi %s859_s12, %s13_s12  }
   0x2   : > { %p139_p1 = scmp.lt.s32.totalorder %s834_s12, 3 }
   0x4   : > { %p140_p2 = pnand %p751_p0, %p139_p1 }
   0x6   : > { %143 = sbr.rel (%p140_p2) target bundleno = 803 (0x323), region = 32 }
   0xd   : > { %s752_s14 = sshll.u32 %s747_s13, 1  ;;  %v276_v48 = vld [vmem:[%s1131_s1] sm:$0xff]  ;;  %v277_v49 = vld [vmem:[%s1131_s1 + $0x8] sm:$0xff]  ;;  %v836_v51 = vmov 0.0|0.0   ;;  %v278_v52 = vld [vmem:[%s1131_s1 + $0x10] sm:$0xff]  ;;  %vm837_vm0 = vmmov 0  }
   0xe   : > { %p166_p3 = scmp.lt.s32.totalorder %s752_s14, 3  ;;  %v802_v50 = vpack.c.bf16 %v277_v49, %v276_v48  ;;  %801 = vmatprep.subr.bf16.mxu0 %v836_v51  ;;  %v279_v53 = vld [vmem:[%s1131_s1 + $0x18] sm:$0xff]  ;;  %v280_v55 = vld [vmem:[%s1131_s1 + $0x20] sm:$0xff]  ;;  %v281_v56 = vld [vmem:[%s1131_s1 + $0x28] sm:$0xff]  ;;  %v838_v61 = vmov 0.0   ;;  %vm311_vm1 = vcmask 130112  }
   0xf   : > { %v805_v54 = vpack.c.bf16 %v279_v53, %v278_v52  ;;  %v808_v57 = vpack.c.bf16 %v281_v56, %v280_v55  ;;  %v282_v58 = vld [vmem:[%s1131_s1 + $0x30] sm:$0xff]  ;;  %v283_v59 = vld [vmem:[%s1131_s1 + $0x38] sm:$0xff]  ;;  %793 = vmatprep.mubr.msk.f32.mxu0 %vm837_vm0, %v838_v61  ;;  %796 = vmatprep.subr.mxu1 %v838_v61  ;;  %vm318_vm2 = vcmask 195712   ;;  %vm325_vm3 = vcmask 261312  }
  0x10   : > { %s1156_s14 = smov (!%p166_p3, %s752_s14), 3  ;;  %803 = vmatpush3.bf16.msra.mxu0 %v802_v50  ;;  %v811_v60 = vpack.c.bf16 %v283_v59, %v282_v58  ;;  %798 = vmatprep.mubr.msk.f32.mxu1 %vm837_vm0, %v838_v61  ;;  %vm332_vm4 = vcmask 326912   ;;  %vm339_vm5 = vcmask 392512   ;;  %vm346_vm6 = vcmask 458112  }
  0x11   : > { %s764_s15 = sshll.u32 %s1156_s14, 7  ;;  %804 = vmatprep.subr.bf16.mxu0 %v836_v51  ;;  %vm353_vm7 = vcmask 523712   ;;  %vm394_vm8 = vcmask 1041409   ;;  %vm396_vm9 = vcmask 523264   ;;  %vm475_vm10 = vcmask 1043456  }
  0x12   : > { %s875_s18 = scalar_lea.vmem %s1130_s0, %s764_s15  ;;  %vm471_vm11 = vcmask 31744   ;;  %s1061_s13 = scalar_lea.vmem %s1133_s3, %s764_s15 }
  0x13   : > { %v878_v0 = vld [vmem:[%s875_s18 + $0x80] sm:$0xff]  ;;  %v881_v1 = vld [vmem:[%s875_s18 + $0x88] sm:$0xff]  ;;  %v892_v5 = vld [vmem:[%s875_s18 + $0x90] sm:$0xff] }
  0x14   : > { %v884_v2 = vld [vmem:[%s875_s18] sm:$0xff]  ;;  %v235_v3 = vadd.f32 %v881_v1, %v878_v0  ;;  %v889_v4 = vld [vmem:[%s875_s18 + $0x8] sm:$0xff]  ;;  %v895_v6 = vld [vmem:[%s875_s18 + $0x98] sm:$0xff]  ;;  %806 = vmatpush3.bf16.msra.mxu0 %v805_v54 }
  0x15   : > { %v211_v7 = vadd.f32 %v889_v4, %v884_v2  ;;  %v900_v8 = vld [vmem:[%s875_s18 + $0x10] sm:$0xff]  ;;  %v903_v9 = vld [vmem:[%s875_s18 + $0x18] sm:$0xff]  ;;  %v238_v10 = vadd.f32 %v895_v6, %v892_v5  ;;  %v910_v12 = vld [vmem:[%s875_s18 + $0xa0] sm:$0xff]  ;;  %807 = vmatprep.subr.bf16.mxu0 %v836_v51 }
  0x16   : > { %236 = vadd.xlane.f32.xlu1 %v235_v3  ;;  %v214_v11 = vadd.f32 %v903_v9, %v900_v8  ;;  %v913_v13 = vld [vmem:[%s875_s18 + $0xa8] sm:$0xff]  ;;  %v916_v14 = vld [vmem:[%s875_s18 + $0x20] sm:$0xff]  ;;  %v926_v18 = vld [vmem:[%s875_s18 + $0xb0] sm:$0xff] }
  0x17   : > { %212 = vadd.xlane.f32.xlu0 %v211_v7  ;;  %v919_v15 = vld [vmem:[%s875_s18 + $0x28] sm:$0xff]  ;;  %v241_v16 = vadd.f32 %v913_v13, %v910_v12  ;;  %v929_v19 = vld [vmem:[%s875_s18 + $0xb8] sm:$0xff]  ;;  %v932_v20 = vld [vmem:[%s875_s18 + $0x30] sm:$0xff] }
  0x18   : > { %v217_v17 = vadd.f32 %v919_v15, %v916_v14  ;;  %1141 = vst [vmem:[#allocation2_spill] sm:$0xff] %v929_v19  ;;  %v935_v21 = vld [vmem:[%s875_s18 + $0x38] sm:$0xff]  ;;  %v244_v22 = vadd.f32 %v929_v19, %v926_v18  ;;  %v942_v24 = vld [vmem:[%s875_s18 + $0xc0] sm:$0xff]  ;;  %v945_v25 = vld [vmem:[%s875_s18 + $0xc8] sm:$0xff]  ;;  %809 = vmatpush3.bf16.msra.mxu0 %v808_v57 }
  0x19   : > { %v220_v23 = vadd.f32 %v935_v21, %v932_v20  ;;  %v948_v26 = vld [vmem:[%s875_s18 + $0x40] sm:$0xff]  ;;  %v951_v27 = vld [vmem:[%s875_s18 + $0x48] sm:$0xff]  ;;  %v247_v28 = vadd.f32 %v945_v25, %v942_v24  ;;  %v958_v30 = vld [vmem:[%s875_s18 + $0xd0] sm:$0xff]  ;;  %810 = vmatprep.subr.bf16.mxu0 %v836_v51 }
  0x1a   : > { %239 = vadd.xlane.f32.xlu1 %v238_v10  ;;  %v223_v29 = vadd.f32 %v951_v27, %v948_v26  ;;  %1142 = vst [vmem:[#allocation3_spill] sm:$0xff] %v958_v30  ;;  %v961_v31 = vld [vmem:[%s875_s18 + $0xd8] sm:$0xff]  ;;  %v964_v32 = vld [vmem:[%s875_s18 + $0x50] sm:$0xff]  ;;  %v974_v36 = vld [vmem:[%s875_s18 + $0xe0] sm:$0xff]  ;;  %v300_v10 = vlaneseq }
  0x1b   : > { %215 = vadd.xlane.f32.xlu0 %v214_v11  ;;  %1143 = vst [vmem:[#allocation4_spill] sm:$0xff] %v961_v31  ;;  %v967_v33 = vld [vmem:[%s875_s18 + $0x58] sm:$0xff]  ;;  %v250_v34 = vadd.f32 %v961_v31, %v958_v30  ;;  %1144 = vst [vmem:[#allocation5_spill] sm:$0xff] %v974_v36  ;;  %v977_v37 = vld [vmem:[%s875_s18 + $0xe8] sm:$0xff] }
  0x1c   : > { %v226_v35 = vadd.f32 %v967_v33, %v964_v32  ;;  %1145 = vst [vmem:[#allocation6_spill] sm:$0xff] %v977_v37  ;;  %v980_v38 = vld [vmem:[%s875_s18 + $0x60] sm:$0xff]  ;;  %v983_v39 = vld [vmem:[%s875_s18 + $0x68] sm:$0xff]  ;;  %v253_v40 = vadd.f32 %v977_v37, %v974_v36  ;;  %v990_v42 = vld [vmem:[%s875_s18 + $0xf0] sm:$0xff]  ;;  %812 = vmatpush3.bf16.msra.mxu0 %v811_v60 }
  0x1d   : > { %v229_v41 = vadd.f32 %v983_v39, %v980_v38  ;;  %1146 = vst [vmem:[#allocation7_spill] sm:$0xff] %v990_v42  ;;  %v993_v43 = vld [vmem:[%s875_s18 + $0xf8] sm:$0xff]  ;;  %v996_v44 = vld [vmem:[%s875_s18 + $0x70] sm:$0xff] }
  0x1e   : > { %242 = vadd.xlane.f32.xlu1 %v241_v16  ;;  %1147 = vst [vmem:[#allocation8_spill] sm:$0xff] %v993_v43  ;;  %v999_v45 = vld [vmem:[%s875_s18 + $0x78] sm:$0xff]  ;;  %v256_v46 = vadd.f32 %v993_v43, %v990_v42 }
  0x1f   : > { %218 = vadd.xlane.f32.xlu0 %v217_v17  ;;  %v232_v47 = vadd.f32 %v999_v45, %v996_v44  ;;  %v301_v17 = vand.u32 127, %v300_v10 }
  0x21   : > { %v341_v51 = vadd.s32 4294967248, %v301_v17 }
  0x22   : > { %245 = vadd.xlane.f32.xlu1 %v244_v22 }
  0x23   : > { %221 = vadd.xlane.f32.xlu0 %v220_v23  ;;  %v1029_v23 = vshrl.u32 %v300_v10, 7 }
  0x26   : > { %248 = vadd.xlane.f32.xlu1 %v247_v28 }
  0x27   : > { %224 = vadd.xlane.f32.xlu0 %v223_v29  ;;  %v306_v29 = vadd.s32 4294967288, %v301_v17 }
  0x29   : > { %v309_v49 = vsub.s32 %v306_v29, %v1029_v23 }
  0x2a   : > { %251 = vadd.xlane.f32.xlu1 %v250_v34  ;;  %v313_v34 = vadd.s32 4294967280, %v301_v17 }
  0x2b   : > { %227 = vadd.xlane.f32.xlu0 %v226_v35  ;;  %v320_v35 = vadd.s32 4294967272, %v301_v17 }
  0x2c   : > { %v316_v50 = vsub.s32 %v313_v34, %v1029_v23 }
  0x2d   : > { %v323_v53 = vsub.s32 %v320_v35, %v1029_v23 }
  0x2e   : > { %254 = vadd.xlane.f32.xlu1 %v253_v40  ;;  %v327_v40 = vadd.s32 4294967264, %v301_v17 }
  0x2f   : > { %230 = vadd.xlane.f32.xlu0 %v229_v41 }
  0x30   : > { %v330_v54 = vsub.s32 %v327_v40, %v1029_v23  ;;  %v348_v40 = vadd.s32 4294967240, %v301_v17 }
  0x32   : > { %257 = vadd.xlane.f32.xlu1 %v256_v46  ;;  %v334_v46 = vadd.s32 4294967256, %v301_v17 }
  0x33   : > { %233 = vadd.xlane.f32.xlu0 %v232_v47  ;;  %v304_v47 = vsub.s32 %v301_v17, %v1029_v23  ;;  %v351_v17 = vsub.s32 %v348_v40, %v1029_v23 }
  0x34   : > { %v337_v57 = vsub.s32 %v334_v46, %v1029_v23 }
  0xa3   : > { %v237_v62 = vpop.xlane.xlu1 %236 }
  0xa4   : > { %v213_v63 = vpop.xlane.xlu0 %212  ;;  %v268_v59 = vmul.f32 0.00390625, %v237_v62 }
  0xa5   : > { %v260_v29 = vmul.f32 0.00390625, %v213_v63 }
  0xa6   : > { %v358_v37 = vrot.slane %v268_v59, %v304_v47 }
  0xa7   : > { %v240_v3 = vpop.xlane.xlu1 %239  ;;  %v305_v19 = vrot.slane %v260_v29, %v304_v47 }
  0xa8   : > { %v216_v7 = vpop.xlane.xlu0 %215  ;;  %v269_v52 = vmul.f32 0.00390625, %v240_v3  ;;  %v344_v3 = vsub.s32 %v341_v51, %v1029_v23 }
  0xa9   : > { %v261_v55 = vmul.f32 0.00390625, %v216_v7 }
  0xaa   : > { %v362_v35 = vrot.slane %v269_v52, %v309_v49 }
  0xab   : > { %v243_v11 = vpop.xlane.xlu1 %242  ;;  %v310_v7 = vrot.slane %v261_v55, %v309_v49 }
  0xac   : > { %v219_v16 = vpop.xlane.xlu0 %218  ;;  %v270_v56 = vmul.f32 0.00390625, %v243_v11  ;;  %v363_v51 = vsel %vm311_vm1, %v362_v35, %v358_v37  ;;  %v470_v35 = vld [vmem:[%s1132_s2] sm:$0xf] }
  0xad   : > { %v262_v60 = vmul.f32 0.00390625, %v219_v16  ;;  %v312_v49 = vsel %vm311_vm1, %v310_v7, %v305_v19  ;;  %797 = vmatpush3.msk.msra.mxu1 %vm475_vm10, %v470_v35 }
  0xae   : > { %v367_v11 = vrot.slane %v270_v56, %v316_v50 }
  0xaf   : > { %v246_v22 = vpop.xlane.xlu1 %245  ;;  %v317_v62 = vrot.slane %v262_v60, %v316_v50 }
  0xb0   : > { %v222_v28 = vpop.xlane.xlu0 %221  ;;  %v271_v61 = vmul.f32 0.00390625, %v246_v22  ;;  %v368_v55 = vsel %vm318_vm2, %v367_v11, %v363_v51 }
  0xb1   : > { %v263_v34 = vmul.f32 0.00390625, %v222_v28  ;;  %v319_v59 = vsel %vm318_vm2, %v317_v62, %v312_v49 }
  0xb2   : > { %v372_v16 = vrot.slane %v271_v61, %v323_v53 }
  0xb3   : > { %v249_v41 = vpop.xlane.xlu1 %248  ;;  %v324_v63 = vrot.slane %v263_v34, %v323_v53 }
  0xb4   : > { %v225_v48 = vpop.xlane.xlu0 %224  ;;  %v272_v43 = vmul.f32 0.00390625, %v249_v41  ;;  %v373_v47 = vsel %vm325_vm3, %v372_v16, %v368_v55 }
  0xb5   : > { %v264_v42 = vmul.f32 0.00390625, %v225_v48  ;;  %v326_v37 = vsel %vm325_vm3, %v324_v63, %v319_v59 }
  0xb6   : > { %v377_v28 = vrot.slane %v272_v43, %v330_v54 }
  0xb7   : > { %v252_v58 = vpop.xlane.xlu1 %251  ;;  %v331_v52 = vrot.slane %v264_v42, %v330_v54 }
  0xb8   : > { %v228_v10 = vpop.xlane.xlu0 %227  ;;  %v273_v31 = vmul.f32 0.00390625, %v252_v58 }
  0xb9   : > { %v265_v30 = vmul.f32 0.00390625, %v228_v10  ;;  %v333_v19 = vsel %vm332_vm4, %v331_v52, %v326_v37  ;;  %v592_v52 = vsub.s32 1, %v1029_v23 }
  0xba   : > { %v382_v48 = vrot.slane %v273_v31, %v337_v57  ;;  %v378_v31 = vsel %vm332_vm4, %v377_v28, %v373_v47  ;;  %v557_v28 = vsub.s32 0, %v1029_v23 }
  0xbb   : > { %v255_v46 = vpop.xlane.xlu1 %254  ;;  %v338_v56 = vrot.slane %v265_v30, %v337_v57 }
  0xbc   : > { %v274_v22 = vmul.f32 0.00390625, %v255_v46  ;;  %v231_v36 = vpop.xlane.xlu0 %230  ;;  %v383_v54 = vsel %vm339_vm5, %v382_v48, %v378_v31 }
  0xbd   : > { %v266_v41 = vmul.f32 0.00390625, %v231_v36  ;;  %v340_v57 = vsel %vm339_vm5, %v338_v56, %v333_v19 }
  0xbe   : > { %v387_v58 = vrot.slane %v274_v22, %v344_v3 }
  0xbf   : > { %v258_v50 = vpop.xlane.xlu1 %257  ;;  %v345_v53 = vrot.slane %v266_v41, %v344_v3 }
  0xc0   : > { %v275_v43 = vmul.f32 0.00390625, %v258_v50  ;;  %v234_v36 = vpop.xlane.xlu0 %233  ;;  %v388_v60 = vsel %vm346_vm6, %v387_v58, %v383_v54 }
  0xc1   : > { %v267_v42 = vmul.f32 0.00390625, %v234_v36  ;;  %v347_v10 = vsel %vm346_vm6, %v345_v53, %v340_v57 }
  0xc2   : > { %v392_v30 = vrot.slane %v275_v43, %v351_v17 }
  0xc3   : > { %v352_v61 = vrot.slane %v267_v42, %v351_v17 }
  0xc4   : > { %v393_v29 = vsel %vm353_vm7, %v392_v30, %v388_v60  ;;  %v1148_v60 = vld [vmem:[#allocation2_spill] sm:$0xff] }
  0xc5   : > { %v354_v34 = vsel %vm353_vm7, %v352_v61, %v347_v10  ;;  %v1149_v61 = vld [vmem:[#allocation5_spill] sm:$0xff]  ;;  %v1150_v10 = vld [vmem:[#allocation6_spill] sm:$0xff] }
  0xc6   : > { %v395_v3 = vsel %vm394_vm8, %v393_v29, %v354_v34  ;;  %v1151_v29 = vld [vmem:[#allocation3_spill] sm:$0xff] }
  0xc7   : > { %794 = vmatmul.mubr.msk.f32.vlgmr.msra.gmra.mrb[0].mxu0 %vm396_vm9, %v395_v3  ;;  %v1152_v3 = vld [vmem:[#allocation4_spill] sm:$0xff] }
 0x19a   : > { %v465_v40 = vpop.f32.mrb[0].mxu0 }
 0x19b   : > { %v469_v7 = vmax.f32 %v465_v40, 0.0  ;;  %v795_v11 = vpop.f32.mrb[1].mxu0  ;;  %v1153_v40 = vld [vmem:[#allocation7_spill] sm:$0xff] }
 0x19c   : > { %v1154_v11 = vld [vmem:[#allocation8_spill] sm:$0xff] }
 0x19d   : > { %799 = vmatmul.mubr.msk.f32.vlgmr.msra.gmra.mrb[0].mxu1 %vm471_vm11, %v469_v7 }
 0x270   : > { %v545_v46 = vpop.f32.mrb[0].mxu1 }
 0x271   : > { %v761_v62 = vmul.f32 -1.442695, %v545_v46  ;;  %v800_v16 = vpop.f32.mrb[1].mxu1 }
 0x273   : > { %824 = vpow2.f32 %v761_v62 }
 0x27d   : > { %v825_v22 = vpop.eup %824 }
 0x27e   : > { %v552_v63 = vadd.f32 1.0, %v825_v22 }
 0x280   : > { %826 = vrcp.f32 %v552_v63 }
 0x28a   : > { %v827_v41 = vpop.eup %826 }
 0x28b   : > { %v558_v51 = vrot.slane %v827_v41, %v557_v28  ;;  %v593_v48 = vrot.slane %v827_v41, %v592_v52 }
 0x28d   : > { %564 = vbcast.lane.b32.xlu1 %v558_v51, 264  ;;  %560 = vbcast.lane.b32.xlu0 %v558_v51, 256 }
 0x291   : > { %568 = vbcast.lane.b32.xlu1 %v558_v51, 272  ;;  %576 = vbcast.lane.b32.xlu0 %v558_v51, 288 }
 0x295   : > { %572 = vbcast.lane.b32.xlu1 %v558_v51, 280  ;;  %584 = vbcast.lane.b32.xlu0 %v558_v51, 304 }
 0x299   : > { %580 = vbcast.lane.b32.xlu1 %v558_v51, 296  ;;  %595 = vbcast.lane.b32.xlu0 %v593_v48, 256 }
 0x29d   : > { %588 = vbcast.lane.b32.xlu1 %v558_v51, 312  ;;  %603 = vbcast.lane.b32.xlu0 %v593_v48, 272 }
 0x2a1   : > { %599 = vbcast.lane.b32.xlu1 %v593_v48, 264  ;;  %611 = vbcast.lane.b32.xlu0 %v593_v48, 288 }
 0x2a5   : > { %607 = vbcast.lane.b32.xlu1 %v593_v48, 280  ;;  %619 = vbcast.lane.b32.xlu0 %v593_v48, 304 }
 0x2a9   : > { %615 = vbcast.lane.b32.xlu1 %v593_v48, 296 }
 0x2ad   : > { %623 = vbcast.lane.b32.xlu1 %v593_v48, 312 }
 0x2ff   : > { %v565_v23 = vpop.permute.xlu1 %564  ;;  %v561_v17 = vpop.permute.xlu0 %560 }
 0x300   : > { %v627_v49 = vmul.f32 %v565_v23, %v900_v8  ;;  %v628_v55 = vmul.f32 %v565_v23, %v903_v9  ;;  %v625_v56 = vmul.f32 %v561_v17, %v884_v2  ;;  %v626_v58 = vmul.f32 %v561_v17, %v889_v4 }
 0x302   : > { %659 = vst [vmem:[%s1061_s13 + $0x10] sm:$0xff] %v627_v49  ;;  %660 = vst [vmem:[%s1061_s13 + $0x18] sm:$0xff] %v628_v55 }
 0x303   : > { %657 = vst [vmem:[%s1061_s13] sm:$0xff] %v625_v56  ;;  %658 = vst [vmem:[%s1061_s13 + $0x8] sm:$0xff] %v626_v58  ;;  %v569_v50 = vpop.permute.xlu1 %568  ;;  %v577_v59 = vpop.permute.xlu0 %576 }
 0x304   : > { %v629_v47 = vmul.f32 %v569_v50, %v916_v14  ;;  %v630_v8 = vmul.f32 %v569_v50, %v919_v15  ;;  %v633_v9 = vmul.f32 %v577_v59, %v948_v26  ;;  %v634_v2 = vmul.f32 %v577_v59, %v951_v27 }
 0x306   : > { %661 = vst [vmem:[%s1061_s13 + $0x20] sm:$0xff] %v629_v47  ;;  %662 = vst [vmem:[%s1061_s13 + $0x28] sm:$0xff] %v630_v8 }
 0x307   : > { %665 = vst [vmem:[%s1061_s13 + $0x40] sm:$0xff] %v633_v9  ;;  %666 = vst [vmem:[%s1061_s13 + $0x48] sm:$0xff] %v634_v2  ;;  %v573_v4 = vpop.permute.xlu1 %572  ;;  %v585_v53 = vpop.permute.xlu0 %584 }
 0x308   : > { %v631_v43 = vmul.f32 %v573_v4, %v932_v20  ;;  %v632_v14 = vmul.f32 %v573_v4, %v935_v21  ;;  %v637_v15 = vmul.f32 %v585_v53, %v980_v38  ;;  %v638_v26 = vmul.f32 %v585_v53, %v983_v39 }
 0x30a   : > { %663 = vst [vmem:[%s1061_s13 + $0x30] sm:$0xff] %v631_v43  ;;  %664 = vst [vmem:[%s1061_s13 + $0x38] sm:$0xff] %v632_v14 }
 0x30b   : > { %669 = vst [vmem:[%s1061_s13 + $0x60] sm:$0xff] %v637_v15  ;;  %670 = vst [vmem:[%s1061_s13 + $0x68] sm:$0xff] %v638_v26  ;;  %v581_v27 = vpop.permute.xlu1 %580  ;;  %v596_v36 = vpop.permute.xlu0 %595 }
 0x30c   : > { %v635_v37 = vmul.f32 %v581_v27, %v964_v32  ;;  %v636_v20 = vmul.f32 %v581_v27, %v967_v33  ;;  %v641_v21 = vmul.f32 %v596_v36, %v878_v0  ;;  %v642_v38 = vmul.f32 %v596_v36, %v881_v1 }
 0x30e   : > { %667 = vst [vmem:[%s1061_s13 + $0x50] sm:$0xff] %v635_v37  ;;  %668 = vst [vmem:[%s1061_s13 + $0x58] sm:$0xff] %v636_v20 }
 0x30f   : > { %673 = vst [vmem:[%s1061_s13 + $0x80] sm:$0xff] %v641_v21  ;;  %674 = vst [vmem:[%s1061_s13 + $0x88] sm:$0xff] %v642_v38  ;;  %v589_v39 = vpop.permute.xlu1 %588  ;;  %v604_v31 = vpop.permute.xlu0 %603 }
 0x310   : > { %v639_v42 = vmul.f32 %v589_v39, %v996_v44  ;;  %v640_v32 = vmul.f32 %v589_v39, %v999_v45  ;;  %v645_v33 = vmul.f32 %v604_v31, %v910_v12  ;;  %v646_v0 = vmul.f32 %v604_v31, %v913_v13 }
 0x312   : > { %671 = vst [vmem:[%s1061_s13 + $0x70] sm:$0xff] %v639_v42  ;;  %672 = vst [vmem:[%s1061_s13 + $0x78] sm:$0xff] %v640_v32 }
 0x313   : > { %677 = vst [vmem:[%s1061_s13 + $0xa0] sm:$0xff] %v645_v33  ;;  %678 = vst [vmem:[%s1061_s13 + $0xa8] sm:$0xff] %v646_v0  ;;  %v600_v1 = vpop.permute.xlu1 %599  ;;  %v612_v19 = vpop.permute.xlu0 %611 }
 0x314   : > { %v643_v54 = vmul.f32 %v600_v1, %v892_v5  ;;  %v644_v44 = vmul.f32 %v600_v1, %v895_v6  ;;  %v649_v45 = vmul.f32 %v612_v19, %v942_v24  ;;  %v650_v12 = vmul.f32 %v612_v19, %v945_v25 }
 0x316   : > { %675 = vst [vmem:[%s1061_s13 + $0x90] sm:$0xff] %v643_v54  ;;  %676 = vst [vmem:[%s1061_s13 + $0x98] sm:$0xff] %v644_v44 }
 0x317   : > { %681 = vst [vmem:[%s1061_s13 + $0xc0] sm:$0xff] %v649_v45  ;;  %682 = vst [vmem:[%s1061_s13 + $0xc8] sm:$0xff] %v650_v12  ;;  %v608_v13 = vpop.permute.xlu1 %607  ;;  %v620_v30 = vpop.permute.xlu0 %619 }
 0x318   : > { %v647_v57 = vmul.f32 %v608_v13, %v926_v18  ;;  %v648_v5 = vmul.f32 %v608_v13, %v1148_v60  ;;  %v653_v6 = vmul.f32 %v620_v30, %v1149_v61  ;;  %v654_v24 = vmul.f32 %v620_v30, %v1150_v10 }
 0x31a   : > { %679 = vst [vmem:[%s1061_s13 + $0xb0] sm:$0xff] %v647_v57  ;;  %680 = vst [vmem:[%s1061_s13 + $0xb8] sm:$0xff] %v648_v5 }
 0x31b   : > { %685 = vst [vmem:[%s1061_s13 + $0xe0] sm:$0xff] %v653_v6  ;;  %686 = vst [vmem:[%s1061_s13 + $0xe8] sm:$0xff] %v654_v24  ;;  %v616_v25 = vpop.permute.xlu1 %615 }
 0x31c   : > { %v651_v34 = vmul.f32 %v616_v25, %v1151_v29  ;;  %v652_v35 = vmul.f32 %v616_v25, %v1152_v3 }
 0x31e   : > { %683 = vst [vmem:[%s1061_s13 + $0xd0] sm:$0xff] %v651_v34  ;;  %684 = vst [vmem:[%s1061_s13 + $0xd8] sm:$0xff] %v652_v35 }
 0x31f   : > { %v624_v18 = vpop.permute.xlu1 %623 }
 0x320   : > { %v655_v7 = vmul.f32 %v624_v18, %v1153_v40  ;;  %v656_v46 = vmul.f32 %v624_v18, %v1154_v11 }
 0x322   : > { %687 = vst [vmem:[%s1061_s13 + $0xf0] sm:$0xff] %v655_v7  ;;  %688 = vst [vmem:[%s1061_s13 + $0xf8] sm:$0xff] %v656_v46 }
 0x323 PF: > { %s13_s12 = sadd.s32 1, %s834_s12  }
 0x324   : > { %p10_p4 = scmp.ge.s32.totalorder %s13_s12, 4  }
 0x326   :  { %12 = sbr.rel (!%p10_p4) target bundleno = 1 (0x1), region = 62 }

</bundles_post_ra>
